<compile_context>
chip_gen: v5e
topology: v5e:2x2
jax: 0.10.0
libtpu: 0.0.40
codegen_flags: <defaults>
</compile_context>

<pallas_src>
import jax
import jax.numpy as jnp
from jax import lax
from jax.experimental import pallas as pl
from jax.experimental.pallas import tpu as pltpu


_LANES = 128          # lane width / chunk size for the two-level index split
_LANE_SHIFT = 7       # log2(_LANES)


def _cdiv(a, b):
    return (a + b - 1) // b


def _round_up(a, b):
    return _cdiv(a, b) * b


# ----------------------------------------------------------------------------
# mode 3 kernel
# ----------------------------------------------------------------------------
def _headcount_mode3_kernel(idx_ref, w_ref, o_ref):
    # idx_ref: (U, TB)      int32 — raw unit counts, batch on the 128-lane axis
    # w_ref:   (U, H, 128)  f32   — relu'd, row-0-zeroed, zero-padded table
    #                               (resident across the whole grid, one DMA)
    # o_ref:   (U, TB)      f32
    U, TB = idx_ref.shape
    H = w_ref.shape[1]

    # Hoisted iotas shared by every unit iteration (JAX does not CSE
    # broadcast_in_dim, so these must not be rebuilt inside the loop).
    l_iota = lax.broadcasted_iota(jnp.int32, (_LANES, 1), 0)   # chunk position
    h_iota = lax.broadcasted_iota(jnp.int32, (H, 1), 0)        # chunk id

    rows = []
    # Small static unroll over units (U ~ 8); per-iteration temporaries are now
    # only (128, TB) so the unrolled live ranges stay well inside VMEM/vregs.
    for u in range(U):
        idx_u = idx_ref[u : u + 1, :]            # (1, TB) static view
        lo = idx_u & (_LANES - 1)                # position inside the 128-chunk
        hi = idx_u >> _LANE_SHIFT                # chunk id (idx >= 0)

        # One-hot over the 128 chunk positions: O(128) VALU ops per element.
        oh_lo = jnp.where(l_iota == lo, 1.0, 0.0)                # (128, TB) f32

        # The actual gather-reduce runs on the MXU: (H, 128) @ (128, TB).
        cand = jnp.dot(w_ref[u], oh_lo,
                       preferred_element_type=jnp.float32)       # (H, TB)

        # Resolve the chunk id with a tiny compare/select + sublane reduce.
        # Out-of-range idx (hi >= H) matches nothing and yields 0.
        row = jnp.sum(jnp.where(h_iota == hi, cand, 0.0),
                      axis=0, keepdims=True)                     # (1, TB)
        rows.append(row)

    # Single full-block, lane-dense store (one unmasked vst path per tile).
    o_ref[...] = jnp.concatenate(rows, axis=0)


def _choose_tiling(B, tb_max=512):
    """Lane-dense batch tile: multiple of 128, >= 2 grid steps when possible."""
    TB = min(tb_max, max(_LANES, _round_up(_cdiv(B, 2), _LANES)))
    B_pad = _round_up(B, TB)
    return TB, B_pad


def _mode3_forward(unit_nums, embed_weight, n_unit, max_unit_size, tb_max=512):
    B, U = unit_nums.shape
    M = max_unit_size
    H = _cdiv(M, _LANES)

    # --- table prep (plain JAX, once per weight) ------------------------------
    w = embed_weight.reshape(n_unit, max_unit_size).astype(jnp.float32)  # (U, M)
    w = jnp.maximum(w, 0.0)          # relu hoisted out of the kernel
    w = w.at[:, 0].set(0.0)          # idx == 0 gathers 0 (replaces (idx!=0) mask);
                                     # applied AFTER relu (required ordering)
    w = jnp.pad(w, ((0, 0), (0, H * _LANES - M)))      # zero pad to H*128
    w3 = w.reshape(n_unit, H, _LANES)                  # (U, H, 128)

    # --- index prep: lane-dense (U, B) layout ---------------------------------
    # TODO(synk): if callers can produce/consume the (U, B) layout directly,
    # these two wrapper transposes (extra HBM passes at large B) can be dropped.
    idx_t = jnp.asarray(unit_nums, jnp.int32).T        # (U, B)

    TB, B_pad = _choose_tiling(B, tb_max)
    if B_pad != B:
        # padded columns have idx == 0 -> gather the zeroed row 0, sliced off below
        idx_t = jnp.pad(idx_t, ((0, 0), (0, B_pad - B)))

    out_t = pl.pallas_call(
        _headcount_mode3_kernel,
        out_shape=jax.ShapeDtypeStruct((U, B_pad), jnp.float32),
        grid=(B_pad // TB,),
        in_specs=[
            pl.BlockSpec((U, TB), lambda i: (0, i)),          # batch-tiled indices
            pl.BlockSpec((U, H, _LANES), lambda i: (0, 0, 0)),  # resident table
        ],
        out_specs=pl.BlockSpec((U, TB), lambda i: (0, i)),
        compiler_params=pltpu.CompilerParams(
            dimension_semantics=("parallel",),   # shard grid across v7x's 2 TCs
            vmem_limit_bytes=32 * 1024 * 1024,
        ),
    )(idx_t, w3)

    return out_t[:, :B].T                                # back to (B, U)


# ----------------------------------------------------------------------------
# module wrapper
# ----------------------------------------------------------------------------
def get_shift_index(n_unit, max_unit_size):
    idx1, idx2 = [], []
    for i in range(n_unit):
        for j in range(max_unit_size):
            if j == max_unit_size - 1:
                continue
            idx1.append(i * max_unit_size + j)
            idx2.append(i * max_unit_size + j + 1)
    return (idx1, idx2)


class HeadcountEffect:
    def __init__(self, n_unit, max_unit_size=800, mode=0):
        assert mode in [0, 1, 2, 3]
        self.n_unit = n_unit
        self.max_unit_size = max_unit_size
        self.mode = mode
        # nn.Embedding(max_unit_size * n_unit, 1), weight initialized to 0.5
        self.embed_weight = jnp.full((max_unit_size * n_unit, 1), 0.5, jnp.float32)
        self.idx1, self.idx2 = get_shift_index(n_unit, max_unit_size)

    def __call__(self, unit_nums):
        B, U = unit_nums.shape
        assert U == self.n_unit
        if self.mode == 0:
            # Pure elementwise clamp (counts > 1 -> 1); left to XLA fusion rather
            # than a standalone pallas_call on a lane-sparse (B, U) array.
            return jnp.minimum(unit_nums, 1).astype(unit_nums.dtype)
        elif self.mode == 1:
            return unit_nums
        elif self.mode == 3:
            return _mode3_forward(
                unit_nums, self.embed_weight, self.n_unit, self.max_unit_size
            )
        # TODO(synk): mode == 2 has no forward branch in the PyTorch module (returns None).
        return None

    def get_mono_loss(self):
        if self.mode != 3:
            return 0.0
        w = self.embed_weight[:, 0]
        diff = lax.stop_gradient(w[jnp.array(self.idx1)]) - w[jnp.array(self.idx2)]
        return jnp.sum(jnp.maximum(diff, 0.0))


# ----------------------------------------------------------------------------
# reference + tests
# ----------------------------------------------------------------------------
def _ref_mode3(unit_nums, embed_weight, n_unit, max_unit_size):
    w = embed_weight.reshape(n_unit, max_unit_size)
    gathered = w[jnp.arange(n_unit)[None, :], unit_nums]
    return jnp.maximum(gathered, 0.0) * (unit_nums != 0).astype(jnp.float32)


if __name__ == "__main__":
    key = jax.random.PRNGKey(0)
    n_unit, max_unit_size = 8, 16

    # --- small batch (single grid step, lane-padded to 128) -------------------
    batch = 2
    k1, k2 = jax.random.split(key)
    unit_nums = jax.random.randint(
        k1, (batch, n_unit), 0, max_unit_size, dtype=jnp.int32
    )

    m3 = HeadcountEffect(n_unit, max_unit_size, mode=3)
    out3 = jax.block_until_ready(m3(unit_nums))
    ref3 = _ref_mode3(unit_nums, m3.embed_weight, n_unit, max_unit_size)
    assert jnp.allclose(out3, ref3, atol=1e-6), "mode 3 mismatch (uniform weights)"

    # non-uniform (deterministic, partly negative) table to exercise the gather + relu
    m3b = HeadcountEffect(n_unit, max_unit_size, mode=3)
    m3b.embed_weight = (
        jnp.arange(n_unit * max_unit_size, dtype=jnp.float32).reshape(-1, 1) / 100.0
        - 0.3
    )
    out3b = jax.block_until_ready(m3b(unit_nums))
    ref3b = _ref_mode3(unit_nums, m3b.embed_weight, n_unit, max_unit_size)
    assert jnp.allclose(out3b, ref3b, atol=1e-6), "mode 3 mismatch (ramp weights)"

    # --- larger batch: exercises tiling, padding and the 2-step grid path -----
    batch_big = 300  # -> TB = 256, B_pad = 512, grid = (2,)
    unit_nums_big = jax.random.randint(
        k2, (batch_big, n_unit), 0, max_unit_size, dtype=jnp.int32
    )
    out3c = jax.block_until_ready(m3b(unit_nums_big))
    ref3c = _ref_mode3(unit_nums_big, m3b.embed_weight, n_unit, max_unit_size)
    assert jnp.allclose(out3c, ref3c, atol=1e-6), "mode 3 mismatch (tiled batch)"

    # --- mode 0: clamp counts > 1 to 1 (plain XLA) -----------------------------
    m0 = HeadcountEffect(n_unit, max_unit_size, mode=0)
    out0 = jax.block_until_ready(m0(unit_nums))
    ref0 = jnp.where(unit_nums > 1, jnp.ones_like(unit_nums), unit_nums)
    assert jnp.array_equal(out0, ref0), "mode 0 mismatch"
    assert out0.dtype == unit_nums.dtype, "mode 0 dtype mismatch"

    # --- mode 1: identity passthrough ------------------------------------------
    m1 = HeadcountEffect(n_unit, max_unit_size, mode=1)
    out1 = jax.block_until_ready(m1(unit_nums))
    assert jnp.array_equal(out1, unit_nums), "mode 1 mismatch"

    # mono loss still works
    _ = jax.block_until_ready(m3b.get_mono_loss())

    print("KERNEL_OK")
</pallas_src>

<mosaic_0001>
module attributes {stable_mosaic.version = 11 : i64} {
  func.func @_headcount_mode3_kernel(%arg0: i32, %arg1: memref<8x128xi32, #tpu.memory_space<vmem>>, %arg2: memref<8x1x128xf32, #tpu.memory_space<vmem>>, %arg3: memref<8x128xf32, #tpu.memory_space<vmem>>) attributes {dimension_semantics = [#tpu.dimension_semantics<parallel>], iteration_bounds = array<i64: 1>, scalar_prefetch = 0 : i64, scratch_operands = 0 : i64, tpu.core_type = #tpu.core_type<tc>, window_params = [{transform_indices = @transform_0, window_bounds = array<i64: 8, 128>}, {pipeline_mode = #tpu.pipeline_mode<synchronous>, transform_indices = @transform_1, window_bounds = array<i64: 8, 1, 128>}, {transform_indices = @transform_2, window_bounds = array<i64: 8, 128>}]} {
    %0 = tpu.iota {dimensions = array<i32: 0>} : vector<128x1xi32>
    %1 = tpu.iota {dimensions = array<i32: 0>} : vector<1x1xi32>
    %c0 = arith.constant 0 : index
    %c0_0 = arith.constant 0 : index
    %2 = vector.load %arg1[%c0, %c0_0] : memref<8x128xi32, #tpu.memory_space<vmem>>, vector<1x128xi32>
    %c127_i32 = arith.constant 127 : i32
    %3 = vector.broadcast %c127_i32 : i32 to vector<1x128xi32>
    %4 = arith.andi %2, %3 : vector<1x128xi32>
    %c7_i32 = arith.constant 7 : i32
    %5 = vector.broadcast %c7_i32 : i32 to vector<1x128xi32>
    %6 = arith.shrsi %2, %5 : vector<1x128xi32>
    %7 = vector.broadcast %0 : vector<128x1xi32> to vector<128x128xi32>
    %8 = vector.broadcast %4 : vector<1x128xi32> to vector<128x128xi32>
    %9 = arith.cmpi eq, %7, %8 : vector<128x128xi32>
    %cst = arith.constant 1.000000e+00 : f32
    %cst_1 = arith.constant 0.000000e+00 : f32
    %10 = vector.broadcast %cst : f32 to vector<128x128xf32>
    %11 = vector.broadcast %cst_1 : f32 to vector<128x128xf32>
    %12 = arith.select %9, %10, %11 : vector<128x128xi1>, vector<128x128xf32>
    %c0_2 = arith.constant 0 : index
    %c0_3 = arith.constant 0 : index
    %c0_4 = arith.constant 0 : index
    %13 = vector.load %arg2[%c0_2, %c0_3, %c0_4] : memref<8x1x128xf32, #tpu.memory_space<vmem>>, vector<1x1x128xf32>
    %14 = vector.shape_cast %13 : vector<1x1x128xf32> to vector<1x128xf32>
    %cst_5 = arith.constant dense<0.000000e+00> : vector<1x128xf32>
    %15 = tpu.matmul %14, %12, %cst_5 {dimension_numbers = #tpu.dot_dimension_numbers<[1], [0], [0], [1], [0, 0, 1, 1], [], []>} : vector<1x128xf32>, vector<128x128xf32>, vector<1x128xf32> -> vector<1x128xf32>
    %16 = vector.broadcast %1 : vector<1x1xi32> to vector<1x128xi32>
    %17 = arith.cmpi eq, %16, %6 : vector<1x128xi32>
    %cst_6 = arith.constant 0.000000e+00 : f32
    %18 = vector.broadcast %cst_6 : f32 to vector<1x128xf32>
    %19 = arith.select %17, %15, %18 : vector<1x128xi1>, vector<1x128xf32>
    %cst_7 = arith.constant dense<0.000000e+00> : vector<128xf32>
    %20 = vector.multi_reduction <add>, %19, %cst_7 [0] : vector<1x128xf32> to vector<128xf32>
    %21 = vector.shape_cast %20 : vector<128xf32> to vector<1x128xf32>
    %c1 = arith.constant 1 : index
    %c0_8 = arith.constant 0 : index
    %22 = vector.load %arg1[%c1, %c0_8] : memref<8x128xi32, #tpu.memory_space<vmem>>, vector<1x128xi32>
    %c127_i32_9 = arith.constant 127 : i32
    %23 = vector.broadcast %c127_i32_9 : i32 to vector<1x128xi32>
    %24 = arith.andi %22, %23 : vector<1x128xi32>
    %c7_i32_10 = arith.constant 7 : i32
    %25 = vector.broadcast %c7_i32_10 : i32 to vector<1x128xi32>
    %26 = arith.shrsi %22, %25 : vector<1x128xi32>
    %27 = vector.broadcast %0 : vector<128x1xi32> to vector<128x128xi32>
    %28 = vector.broadcast %24 : vector<1x128xi32> to vector<128x128xi32>
    %29 = arith.cmpi eq, %27, %28 : vector<128x128xi32>
    %cst_11 = arith.constant 1.000000e+00 : f32
    %cst_12 = arith.constant 0.000000e+00 : f32
    %30 = vector.broadcast %cst_11 : f32 to vector<128x128xf32>
    %31 = vector.broadcast %cst_12 : f32 to vector<128x128xf32>
    %32 = arith.select %29, %30, %31 : vector<128x128xi1>, vector<128x128xf32>
    %c1_13 = arith.constant 1 : index
    %c0_14 = arith.constant 0 : index
    %c0_15 = arith.constant 0 : index
    %33 = vector.load %arg2[%c1_13, %c0_14, %c0_15] : memref<8x1x128xf32, #tpu.memory_space<vmem>>, vector<1x1x128xf32>
    %34 = vector.shape_cast %33 : vector<1x1x128xf32> to vector<1x128xf32>
    %cst_16 = arith.constant dense<0.000000e+00> : vector<1x128xf32>
    %35 = tpu.matmul %34, %32, %cst_16 {dimension_numbers = #tpu.dot_dimension_numbers<[1], [0], [0], [1], [0, 0, 1, 1], [], []>} : vector<1x128xf32>, vector<128x128xf32>, vector<1x128xf32> -> vector<1x128xf32>
    %36 = vector.broadcast %1 : vector<1x1xi32> to vector<1x128xi32>
    %37 = arith.cmpi eq, %36, %26 : vector<1x128xi32>
    %cst_17 = arith.constant 0.000000e+00 : f32
    %38 = vector.broadcast %cst_17 : f32 to vector<1x128xf32>
    %39 = arith.select %37, %35, %38 : vector<1x128xi1>, vector<1x128xf32>
    %cst_18 = arith.constant dense<0.000000e+00> : vector<128xf32>
    %40 = vector.multi_reduction <add>, %39, %cst_18 [0] : vector<1x128xf32> to vector<128xf32>
    %41 = vector.shape_cast %40 : vector<128xf32> to vector<1x128xf32>
    %c2 = arith.constant 2 : index
    %c0_19 = arith.constant 0 : index
    %42 = vector.load %arg1[%c2, %c0_19] : memref<8x128xi32, #tpu.memory_space<vmem>>, vector<1x128xi32>
    %c127_i32_20 = arith.constant 127 : i32
    %43 = vector.broadcast %c127_i32_20 : i32 to vector<1x128xi32>
    %44 = arith.andi %42, %43 : vector<1x128xi32>
    %c7_i32_21 = arith.constant 7 : i32
    %45 = vector.broadcast %c7_i32_21 : i32 to vector<1x128xi32>
    %46 = arith.shrsi %42, %45 : vector<1x128xi32>
    %47 = vector.broadcast %0 : vector<128x1xi32> to vector<128x128xi32>
    %48 = vector.broadcast %44 : vector<1x128xi32> to vector<128x128xi32>
    %49 = arith.cmpi eq, %47, %48 : vector<128x128xi32>
    %cst_22 = arith.constant 1.000000e+00 : f32
    %cst_23 = arith.constant 0.000000e+00 : f32
    %50 = vector.broadcast %cst_22 : f32 to vector<128x128xf32>
    %51 = vector.broadcast %cst_23 : f32 to vector<128x128xf32>
    %52 = arith.select %49, %50, %51 : vector<128x128xi1>, vector<128x128xf32>
    %c2_24 = arith.constant 2 : index
    %c0_25 = arith.constant 0 : index
    %c0_26 = arith.constant 0 : index
    %53 = vector.load %arg2[%c2_24, %c0_25, %c0_26] : memref<8x1x128xf32, #tpu.memory_space<vmem>>, vector<1x1x128xf32>
    %54 = vector.shape_cast %53 : vector<1x1x128xf32> to vector<1x128xf32>
    %cst_27 = arith.constant dense<0.000000e+00> : vector<1x128xf32>
    %55 = tpu.matmul %54, %52, %cst_27 {dimension_numbers = #tpu.dot_dimension_numbers<[1], [0], [0], [1], [0, 0, 1, 1], [], []>} : vector<1x128xf32>, vector<128x128xf32>, vector<1x128xf32> -> vector<1x128xf32>
    %56 = vector.broadcast %1 : vector<1x1xi32> to vector<1x128xi32>
    %57 = arith.cmpi eq, %56, %46 : vector<1x128xi32>
    %cst_28 = arith.constant 0.000000e+00 : f32
    %58 = vector.broadcast %cst_28 : f32 to vector<1x128xf32>
    %59 = arith.select %57, %55, %58 : vector<1x128xi1>, vector<1x128xf32>
    %cst_29 = arith.constant dense<0.000000e+00> : vector<128xf32>
    %60 = vector.multi_reduction <add>, %59, %cst_29 [0] : vector<1x128xf32> to vector<128xf32>
    %61 = vector.shape_cast %60 : vector<128xf32> to vector<1x128xf32>
    %c3 = arith.constant 3 : index
    %c0_30 = arith.constant 0 : index
    %62 = vector.load %arg1[%c3, %c0_30] : memref<8x128xi32, #tpu.memory_space<vmem>>, vector<1x128xi32>
    %c127_i32_31 = arith.constant 127 : i32
    %63 = vector.broadcast %c127_i32_31 : i32 to vector<1x128xi32>
    %64 = arith.andi %62, %63 : vector<1x128xi32>
    %c7_i32_32 = arith.constant 7 : i32
    %65 = vector.broadcast %c7_i32_32 : i32 to vector<1x128xi32>
    %66 = arith.shrsi %62, %65 : vector<1x128xi32>
    %67 = vector.broadcast %0 : vector<128x1xi32> to vector<128x128xi32>
    %68 = vector.broadcast %64 : vector<1x128xi32> to vector<128x128xi32>
    %69 = arith.cmpi eq, %67, %68 : vector<128x128xi32>
    %cst_33 = arith.constant 1.000000e+00 : f32
    %cst_34 = arith.constant 0.000000e+00 : f32
    %70 = vector.broadcast %cst_33 : f32 to vector<128x128xf32>
    %71 = vector.broadcast %cst_34 : f32 to vector<128x128xf32>
    %72 = arith.select %69, %70, %71 : vector<128x128xi1>, vector<128x128xf32>
    %c3_35 = arith.constant 3 : index
    %c0_36 = arith.constant 0 : index
    %c0_37 = arith.constant 0 : index
    %73 = vector.load %arg2[%c3_35, %c0_36, %c0_37] : memref<8x1x128xf32, #tpu.memory_space<vmem>>, vector<1x1x128xf32>
    %74 = vector.shape_cast %73 : vector<1x1x128xf32> to vector<1x128xf32>
    %cst_38 = arith.constant dense<0.000000e+00> : vector<1x128xf32>
    %75 = tpu.matmul %74, %72, %cst_38 {dimension_numbers = #tpu.dot_dimension_numbers<[1], [0], [0], [1], [0, 0, 1, 1], [], []>} : vector<1x128xf32>, vector<128x128xf32>, vector<1x128xf32> -> vector<1x128xf32>
    %76 = vector.broadcast %1 : vector<1x1xi32> to vector<1x128xi32>
    %77 = arith.cmpi eq, %76, %66 : vector<1x128xi32>
    %cst_39 = arith.constant 0.000000e+00 : f32
    %78 = vector.broadcast %cst_39 : f32 to vector<1x128xf32>
    %79 = arith.select %77, %75, %78 : vector<1x128xi1>, vector<1x128xf32>
    %cst_40 = arith.constant dense<0.000000e+00> : vector<128xf32>
    %80 = vector.multi_reduction <add>, %79, %cst_40 [0] : vector<1x128xf32> to vector<128xf32>
    %81 = vector.shape_cast %80 : vector<128xf32> to vector<1x128xf32>
    %c4 = arith.constant 4 : index
    %c0_41 = arith.constant 0 : index
    %82 = vector.load %arg1[%c4, %c0_41] : memref<8x128xi32, #tpu.memory_space<vmem>>, vector<1x128xi32>
    %c127_i32_42 = arith.constant 127 : i32
    %83 = vector.broadcast %c127_i32_42 : i32 to vector<1x128xi32>
    %84 = arith.andi %82, %83 : vector<1x128xi32>
    %c7_i32_43 = arith.constant 7 : i32
    %85 = vector.broadcast %c7_i32_43 : i32 to vector<1x128xi32>
    %86 = arith.shrsi %82, %85 : vector<1x128xi32>
    %87 = vector.broadcast %0 : vector<128x1xi32> to vector<128x128xi32>
    %88 = vector.broadcast %84 : vector<1x128xi32> to vector<128x128xi32>
    %89 = arith.cmpi eq, %87, %88 : vector<128x128xi32>
    %cst_44 = arith.constant 1.000000e+00 : f32
    %cst_45 = arith.constant 0.000000e+00 : f32
    %90 = vector.broadcast %cst_44 : f32 to vector<128x128xf32>
    %91 = vector.broadcast %cst_45 : f32 to vector<128x128xf32>
    %92 = arith.select %89, %90, %91 : vector<128x128xi1>, vector<128x128xf32>
    %c4_46 = arith.constant 4 : index
    %c0_47 = arith.constant 0 : index
    %c0_48 = arith.constant 0 : index
    %93 = vector.load %arg2[%c4_46, %c0_47, %c0_48] : memref<8x1x128xf32, #tpu.memory_space<vmem>>, vector<1x1x128xf32>
    %94 = vector.shape_cast %93 : vector<1x1x128xf32> to vector<1x128xf32>
    %cst_49 = arith.constant dense<0.000000e+00> : vector<1x128xf32>
    %95 = tpu.matmul %94, %92, %cst_49 {dimension_numbers = #tpu.dot_dimension_numbers<[1], [0], [0], [1], [0, 0, 1, 1], [], []>} : vector<1x128xf32>, vector<128x128xf32>, vector<1x128xf32> -> vector<1x128xf32>
    %96 = vector.broadcast %1 : vector<1x1xi32> to vector<1x128xi32>
    %97 = arith.cmpi eq, %96, %86 : vector<1x128xi32>
    %cst_50 = arith.constant 0.000000e+00 : f32
    %98 = vector.broadcast %cst_50 : f32 to vector<1x128xf32>
    %99 = arith.select %97, %95, %98 : vector<1x128xi1>, vector<1x128xf32>
    %cst_51 = arith.constant dense<0.000000e+00> : vector<128xf32>
    %100 = vector.multi_reduction <add>, %99, %cst_51 [0] : vector<1x128xf32> to vector<128xf32>
    %101 = vector.shape_cast %100 : vector<128xf32> to vector<1x128xf32>
    %c5 = arith.constant 5 : index
    %c0_52 = arith.constant 0 : index
    %102 = vector.load %arg1[%c5, %c0_52] : memref<8x128xi32, #tpu.memory_space<vmem>>, vector<1x128xi32>
    %c127_i32_53 = arith.constant 127 : i32
    %103 = vector.broadcast %c127_i32_53 : i32 to vector<1x128xi32>
    %104 = arith.andi %102, %103 : vector<1x128xi32>
    %c7_i32_54 = arith.constant 7 : i32
    %105 = vector.broadcast %c7_i32_54 : i32 to vector<1x128xi32>
    %106 = arith.shrsi %102, %105 : vector<1x128xi32>
    %107 = vector.broadcast %0 : vector<128x1xi32> to vector<128x128xi32>
    %108 = vector.broadcast %104 : vector<1x128xi32> to vector<128x128xi32>
    %109 = arith.cmpi eq, %107, %108 : vector<128x128xi32>
    %cst_55 = arith.constant 1.000000e+00 : f32
    %cst_56 = arith.constant 0.000000e+00 : f32
    %110 = vector.broadcast %cst_55 : f32 to vector<128x128xf32>
    %111 = vector.broadcast %cst_56 : f32 to vector<128x128xf32>
    %112 = arith.select %109, %110, %111 : vector<128x128xi1>, vector<128x128xf32>
    %c5_57 = arith.constant 5 : index
    %c0_58 = arith.constant 0 : index
    %c0_59 = arith.constant 0 : index
    %113 = vector.load %arg2[%c5_57, %c0_58, %c0_59] : memref<8x1x128xf32, #tpu.memory_space<vmem>>, vector<1x1x128xf32>
    %114 = vector.shape_cast %113 : vector<1x1x128xf32> to vector<1x128xf32>
    %cst_60 = arith.constant dense<0.000000e+00> : vector<1x128xf32>
    %115 = tpu.matmul %114, %112, %cst_60 {dimension_numbers = #tpu.dot_dimension_numbers<[1], [0], [0], [1], [0, 0, 1, 1], [], []>} : vector<1x128xf32>, vector<128x128xf32>, vector<1x128xf32> -> vector<1x128xf32>
    %116 = vector.broadcast %1 : vector<1x1xi32> to vector<1x128xi32>
    %117 = arith.cmpi eq, %116, %106 : vector<1x128xi32>
    %cst_61 = arith.constant 0.000000e+00 : f32
    %118 = vector.broadcast %cst_61 : f32 to vector<1x128xf32>
    %119 = arith.select %117, %115, %118 : vector<1x128xi1>, vector<1x128xf32>
    %cst_62 = arith.constant dense<0.000000e+00> : vector<128xf32>
    %120 = vector.multi_reduction <add>, %119, %cst_62 [0] : vector<1x128xf32> to vector<128xf32>
    %121 = vector.shape_cast %120 : vector<128xf32> to vector<1x128xf32>
    %c6 = arith.constant 6 : index
    %c0_63 = arith.constant 0 : index
    %122 = vector.load %arg1[%c6, %c0_63] : memref<8x128xi32, #tpu.memory_space<vmem>>, vector<1x128xi32>
    %c127_i32_64 = arith.constant 127 : i32
    %123 = vector.broadcast %c127_i32_64 : i32 to vector<1x128xi32>
    %124 = arith.andi %122, %123 : vector<1x128xi32>
    %c7_i32_65 = arith.constant 7 : i32
    %125 = vector.broadcast %c7_i32_65 : i32 to vector<1x128xi32>
    %126 = arith.shrsi %122, %125 : vector<1x128xi32>
    %127 = vector.broadcast %0 : vector<128x1xi32> to vector<128x128xi32>
    %128 = vector.broadcast %124 : vector<1x128xi32> to vector<128x128xi32>
    %129 = arith.cmpi eq, %127, %128 : vector<128x128xi32>
    %cst_66 = arith.constant 1.000000e+00 : f32
    %cst_67 = arith.constant 0.000000e+00 : f32
    %130 = vector.broadcast %cst_66 : f32 to vector<128x128xf32>
    %131 = vector.broadcast %cst_67 : f32 to vector<128x128xf32>
    %132 = arith.select %129, %130, %131 : vector<128x128xi1>, vector<128x128xf32>
    %c6_68 = arith.constant 6 : index
    %c0_69 = arith.constant 0 : index
    %c0_70 = arith.constant 0 : index
    %133 = vector.load %arg2[%c6_68, %c0_69, %c0_70] : memref<8x1x128xf32, #tpu.memory_space<vmem>>, vector<1x1x128xf32>
    %134 = vector.shape_cast %133 : vector<1x1x128xf32> to vector<1x128xf32>
    %cst_71 = arith.constant dense<0.000000e+00> : vector<1x128xf32>
    %135 = tpu.matmul %134, %132, %cst_71 {dimension_numbers = #tpu.dot_dimension_numbers<[1], [0], [0], [1], [0, 0, 1, 1], [], []>} : vector<1x128xf32>, vector<128x128xf32>, vector<1x128xf32> -> vector<1x128xf32>
    %136 = vector.broadcast %1 : vector<1x1xi32> to vector<1x128xi32>
    %137 = arith.cmpi eq, %136, %126 : vector<1x128xi32>
    %cst_72 = arith.constant 0.000000e+00 : f32
    %138 = vector.broadcast %cst_72 : f32 to vector<1x128xf32>
    %139 = arith.select %137, %135, %138 : vector<1x128xi1>, vector<1x128xf32>
    %cst_73 = arith.constant dense<0.000000e+00> : vector<128xf32>
    %140 = vector.multi_reduction <add>, %139, %cst_73 [0] : vector<1x128xf32> to vector<128xf32>
    %141 = vector.shape_cast %140 : vector<128xf32> to vector<1x128xf32>
    %c7 = arith.constant 7 : index
    %c0_74 = arith.constant 0 : index
    %142 = vector.load %arg1[%c7, %c0_74] : memref<8x128xi32, #tpu.memory_space<vmem>>, vector<1x128xi32>
    %c127_i32_75 = arith.constant 127 : i32
    %143 = vector.broadcast %c127_i32_75 : i32 to vector<1x128xi32>
    %144 = arith.andi %142, %143 : vector<1x128xi32>
    %c7_i32_76 = arith.constant 7 : i32
    %145 = vector.broadcast %c7_i32_76 : i32 to vector<1x128xi32>
    %146 = arith.shrsi %142, %145 : vector<1x128xi32>
    %147 = vector.broadcast %0 : vector<128x1xi32> to vector<128x128xi32>
    %148 = vector.broadcast %144 : vector<1x128xi32> to vector<128x128xi32>
    %149 = arith.cmpi eq, %147, %148 : vector<128x128xi32>
    %cst_77 = arith.constant 1.000000e+00 : f32
    %cst_78 = arith.constant 0.000000e+00 : f32
    %150 = vector.broadcast %cst_77 : f32 to vector<128x128xf32>
    %151 = vector.broadcast %cst_78 : f32 to vector<128x128xf32>
    %152 = arith.select %149, %150, %151 : vector<128x128xi1>, vector<128x128xf32>
    %c7_79 = arith.constant 7 : index
    %c0_80 = arith.constant 0 : index
    %c0_81 = arith.constant 0 : index
    %153 = vector.load %arg2[%c7_79, %c0_80, %c0_81] : memref<8x1x128xf32, #tpu.memory_space<vmem>>, vector<1x1x128xf32>
    %154 = vector.shape_cast %153 : vector<1x1x128xf32> to vector<1x128xf32>
    %cst_82 = arith.constant dense<0.000000e+00> : vector<1x128xf32>
    %155 = tpu.matmul %154, %152, %cst_82 {dimension_numbers = #tpu.dot_dimension_numbers<[1], [0], [0], [1], [0, 0, 1, 1], [], []>} : vector<1x128xf32>, vector<128x128xf32>, vector<1x128xf32> -> vector<1x128xf32>
    %156 = vector.broadcast %1 : vector<1x1xi32> to vector<1x128xi32>
    %157 = arith.cmpi eq, %156, %146 : vector<1x128xi32>
    %cst_83 = arith.constant 0.000000e+00 : f32
    %158 = vector.broadcast %cst_83 : f32 to vector<1x128xf32>
    %159 = arith.select %157, %155, %158 : vector<1x128xi1>, vector<1x128xf32>
    %cst_84 = arith.constant dense<0.000000e+00> : vector<128xf32>
    %160 = vector.multi_reduction <add>, %159, %cst_84 [0] : vector<1x128xf32> to vector<128xf32>
    %161 = vector.shape_cast %160 : vector<128xf32> to vector<1x128xf32>
    %162 = tpu.concatenate %21, %41, %61, %81, %101, %121, %141, %161 in 0 : vector<1x128xf32>, vector<1x128xf32>, vector<1x128xf32>, vector<1x128xf32>, vector<1x128xf32>, vector<1x128xf32>, vector<1x128xf32>, vector<1x128xf32> -> vector<8x128xf32>
    %c0_85 = arith.constant 0 : index
    %c0_86 = arith.constant 0 : index
    %163 = vector.load %arg3[%c0_85, %c0_86] : memref<8x128xf32, #tpu.memory_space<vmem>>, vector<8x128xf32>
    tpu.vector_store %arg3[%c0_85, %c0_86], %162 {strides = array<i32>} : memref<8x128xf32, #tpu.memory_space<vmem>>, vector<8x128xf32>,
    return
  }
  func.func @transform_0(%arg0: i32) -> (i32, i32) {
    %c0_i32 = arith.constant 0 : i32
    %c0_i32_0 = arith.constant 0 : i32
    return %c0_i32, %arg0 : i32, i32
  }
  func.func @transform_1(%arg0: i32) -> (i32, i32, i32) {
    %c0_i32 = arith.constant 0 : i32
    %c0_i32_0 = arith.constant 0 : i32
    %c0_i32_1 = arith.constant 0 : i32
    %c0_i32_2 = arith.constant 0 : i32
    return %c0_i32, %c0_i32_0, %c0_i32_1 : i32, i32, i32
  }
  func.func @transform_2(%arg0: i32) -> (i32, i32) {
    %c0_i32 = arith.constant 0 : i32
    %c0_i32_0 = arith.constant 0 : i32
    return %c0_i32, %arg0 : i32, i32
  }
}

</mosaic_0001>

<bundles_post_ra>
// kernel: tpu_custom_call.1
= control target key start
LH: loop header
LB: loop body
LE: loop exit
PB: predicated region body
PF: predicated region fallthrough
CT: control target
= control target key end

     0   :  { %7 = vsyncpa [#allocation3], 0  ;;  %s1347_s0 = inlined_call_operand.hbm [shape: s32[8,128], index: 0, kind: input, shape index: {}]   ;;  %s1348_s1 = inlined_call_operand.hbm [shape: f32[8,1,128], index: 1, kind: input, shape index: {}]   ;;  %s1349_s2 = inlined_call_operand.hbm [shape: f32[8,128], index: 2, kind: output, shape index: {}]  }
   0x1   :  { %8 = vsyncpa [#allocation6], 0 }
   0x2   :  { %9 = vsyncpa [#allocation4], 0  ;;  %s15_s11 = sshll.u32 %s1347_s0, 4  ;;  %s812_s12 = smov [#allocation2]   ;;  %s16_s11 = int_to_ptr.hbm [resolvable:$true] %s15_s11 }
   0x3   :  { %s17_s13 = sshll.u32 %s812_s12, 4  ;;  %s25_s16 = sshll.u32 %s1348_s1, 4  ;;  %s18_s13 = int_to_ptr.vmem [resolvable:$true] %s17_s13  ;;  %s26_s16 = int_to_ptr.hbm [resolvable:$true] %s25_s16 }
   0x4   :  { %20 = dma.hbm_to_vmem [thread:$0]  %s16_s11, 128, %s18_s13, [#allocation3]  }
   0x5   :  { %s813_s17 = smov [#allocation5]   ;;  %s814_s19 = smov 16  }
   0x6   :  { %s27_s18 = sshll.u32 %s813_s17, 4  ;;  %s815_s20 = smov 1   ;;  %s28_s18 = int_to_ptr.vmem [resolvable:$true] %s27_s18 }
   0x7   :  { %33 = dma.hbm_to_vmem [thread:$0]  %s26_s16, 128, %s28_s18, [#allocation6], %s814_s19, %s814_s19, %s815_s20  }
   0x8   :  { %806 = dma.done.wait [#allocation3], 128  }
   0x9   :  { %807 = vsyncadd [#allocation3], 4294967168 }
   0xa   :  { %808 = dma.done.wait [#allocation6], 128  }
   0xb   :  { %809 = vsyncadd [#allocation6], 4294967168  ;;  %v42_v0 = vlaneseq  ;;  %v844_v3 = vld [vmem:[#allocation2] sm:$0x1]  ;;  %v846_v4 = vld [vmem:[#allocation2 + $0x2] sm:$0x1] }
   0xc   :  { %v848_v5 = vld [vmem:[#allocation2 + $0x1] sm:$0x1]  ;;  %v60_v6 = vand.u32 127, %v844_v3  ;;  %v181_v7 = vand.u32 127, %v846_v4  ;;  %v853_v9 = vld [vmem:[#allocation2 + $0x3] sm:$0x1] }
   0xd   :  { %v839_v1 = vshrl.u32 %v42_v0, 7  ;;  %v120_v8 = vand.u32 127, %v848_v5  ;;  %v242_v11 = vand.u32 127, %v853_v9  ;;  %v816_v18 = vmov 1.0   ;;  %v1026_v28 = vld [vmem:[#allocation2 + $0x4] sm:$0x1] }
   0xe   :  { %v859_v12 = vperm.slane %v60_v6, 0  ;;  %v861_v13 = vperm.slane %v181_v7, 0  ;;  %v1028_v29 = vld [vmem:[#allocation2 + $0x6] sm:$0x1]  ;;  %v1039_v31 = vld [vmem:[#allocation2 + $0x5] sm:$0x1] }
   0xf   :  { %v842_v2 = vadd.s32 120, %v839_v1  ;;  %v856_v10 = vadd.s32 112, %v839_v1  ;;  %v863_v14 = vperm.slane %v120_v8, 0  ;;  %v866_v15 = vadd.s32 104, %v839_v1  ;;  %v1041_v32 = vld [vmem:[#allocation2 + $0x7] sm:$0x1] }
  0x10   :  { %v868_v16 = vperm.slane %v242_v11, 0  ;;  %v871_v17 = vadd.s32 96, %v839_v1  ;;  %v898_v19 = vadd.s32 88, %v839_v1  ;;  %v913_v20 = vadd.s32 80, %v839_v1  ;;  %v217_v42 = vld [vmem:[#allocation5 + $0x2] sm:$0x1] }
  0x11   :  { %vm78_vm0 = vcmp.eq.s32.totalorder %v842_v2, %v859_v12  ;;  %vm199_vm1 = vcmp.eq.s32.totalorder %v842_v2, %v861_v13  ;;  %vm138_vm2 = vcmp.eq.s32.totalorder %v842_v2, %v863_v14  ;;  %vm77_vm3 = vcmp.eq.s32.totalorder %v856_v10, %v859_v12  ;;  %v278_v43 = vld [vmem:[#allocation5 + $0x3] sm:$0x1]  ;;  %v95_v44 = vld [vmem:[#allocation5] sm:$0x1]  ;;  %v156_v45 = vld [vmem:[#allocation5 + $0x1] sm:$0x1] }
  0x12   :  { %600 = vmatpush.msk.msra.mxu0 %vm78_vm0, %v816_v18  ;;  %632 = vmatpush.msk.msra.mxu2 %vm199_vm1, %v816_v18  ;;  %vm260_vm4 = vcmp.eq.s32.totalorder %v842_v2, %v868_v16  ;;  %vm198_vm5 = vcmp.eq.s32.totalorder %v856_v10, %v861_v13  ;;  %vm137_vm6 = vcmp.eq.s32.totalorder %v856_v10, %v863_v14  ;;  %v928_v21 = vadd.s32 72, %v839_v1  ;;  %v339_v46 = vld [vmem:[#allocation5 + $0x4] sm:$0x1]  ;;  %v461_v47 = vld [vmem:[#allocation5 + $0x6] sm:$0x1]  ;;  %s817_s0 = smov [#allocation7]  }
  0x13   :  { %616 = vmatpush.msk.msra.mxu1 %vm138_vm2, %v816_v18  ;;  %648 = vmatpush.msk.msra.mxu3 %vm260_vm4, %v816_v18  ;;  %vm259_vm7 = vcmp.eq.s32.totalorder %v856_v10, %v868_v16  ;;  %vm76_vm8 = vcmp.eq.s32.totalorder %v866_v15, %v859_v12  ;;  %vm197_vm9 = vcmp.eq.s32.totalorder %v866_v15, %v861_v13  ;;  %v943_v22 = vadd.s32 64, %v839_v1  ;;  %v400_v48 = vld [vmem:[#allocation5 + $0x5] sm:$0x1]  ;;  %v522_v49 = vld [vmem:[#allocation5 + $0x7] sm:$0x1]  ;;  %s587_s1 = sshll.u32 %s817_s0, 4  ;;  %s588_s1 = int_to_ptr.vmem [resolvable:$true] %s587_s1 }
  0x14   :  { %601 = vmatpush.msk.msra.mxu0 %vm77_vm3, %v816_v18  ;;  %633 = vmatpush.msk.msra.mxu2 %vm198_vm5, %v816_v18  ;;  %vm136_vm10 = vcmp.eq.s32.totalorder %v866_v15, %v863_v14  ;;  %vm258_vm11 = vcmp.eq.s32.totalorder %v866_v15, %v868_v16  ;;  %vm75_vm12 = vcmp.eq.s32.totalorder %v871_v17, %v859_v12  ;;  %v958_v23 = vadd.s32 56, %v839_v1  ;;  %s589_s23 = sshll.u32 %s1349_s2, 4  ;;  %s590_s23 = int_to_ptr.hbm [resolvable:$true] %s589_s23 }
  0x15   :  { %617 = vmatpush.msk.msra.mxu1 %vm137_vm6, %v816_v18  ;;  %649 = vmatpush.msk.msra.mxu3 %vm259_vm7, %v816_v18  ;;  %vm196_vm13 = vcmp.eq.s32.totalorder %v871_v17, %v861_v13  ;;  %vm135_vm14 = vcmp.eq.s32.totalorder %v871_v17, %v863_v14  ;;  %vm257_vm15 = vcmp.eq.s32.totalorder %v871_v17, %v868_v16  ;;  %v973_v24 = vadd.s32 48, %v839_v1 }
  0x16   :  { %602 = vmatpush.msk.msra.mxu0 %vm76_vm8, %v816_v18  ;;  %634 = vmatpush.msk.msra.mxu2 %vm197_vm9, %v816_v18  ;;  %vm74_vm0 = vcmp.eq.s32.totalorder %v898_v19, %v859_v12  ;;  %vm195_vm1 = vcmp.eq.s32.totalorder %v898_v19, %v861_v13  ;;  %vm134_vm2 = vcmp.eq.s32.totalorder %v898_v19, %v863_v14  ;;  %v988_v25 = vadd.s32 40, %v839_v1 }
  0x17   :  { %618 = vmatpush.msk.msra.mxu1 %vm136_vm10, %v816_v18  ;;  %650 = vmatpush.msk.msra.mxu3 %vm258_vm11, %v816_v18  ;;  %vm256_vm3 = vcmp.eq.s32.totalorder %v898_v19, %v868_v16  ;;  %vm73_vm4 = vcmp.eq.s32.totalorder %v913_v20, %v859_v12  ;;  %vm194_vm5 = vcmp.eq.s32.totalorder %v913_v20, %v861_v13  ;;  %v1003_v26 = vadd.s32 32, %v839_v1 }
  0x18   :  { %603 = vmatpush.msk.msra.mxu0 %vm75_vm12, %v816_v18  ;;  %635 = vmatpush.msk.msra.mxu2 %vm196_vm13, %v816_v18  ;;  %vm133_vm6 = vcmp.eq.s32.totalorder %v913_v20, %v863_v14  ;;  %vm255_vm7 = vcmp.eq.s32.totalorder %v913_v20, %v868_v16  ;;  %vm72_vm8 = vcmp.eq.s32.totalorder %v928_v21, %v859_v12  ;;  %v1018_v27 = vadd.s32 24, %v839_v1 }
  0x19   :  { %619 = vmatpush.msk.msra.mxu1 %vm135_vm14, %v816_v18  ;;  %651 = vmatpush.msk.msra.mxu3 %vm257_vm15, %v816_v18  ;;  %vm193_vm9 = vcmp.eq.s32.totalorder %v928_v21, %v861_v13  ;;  %vm132_vm10 = vcmp.eq.s32.totalorder %v928_v21, %v863_v14  ;;  %vm254_vm11 = vcmp.eq.s32.totalorder %v928_v21, %v868_v16  ;;  %v1037_v30 = vadd.s32 16, %v839_v1 }
  0x1a   :  { %604 = vmatpush.msk.msra.mxu0 %vm74_vm0, %v816_v18  ;;  %636 = vmatpush.msk.msra.mxu2 %vm195_vm1, %v816_v18  ;;  %vm71_vm12 = vcmp.eq.s32.totalorder %v943_v22, %v859_v12  ;;  %vm192_vm13 = vcmp.eq.s32.totalorder %v943_v22, %v861_v13  ;;  %vm131_vm14 = vcmp.eq.s32.totalorder %v943_v22, %v863_v14  ;;  %v1056_v33 = vadd.s32 8, %v839_v1 }
  0x1b   :  { %620 = vmatpush.msk.msra.mxu1 %vm134_vm2, %v816_v18  ;;  %652 = vmatpush.msk.msra.mxu3 %vm256_vm3, %v816_v18  ;;  %vm253_vm15 = vcmp.eq.s32.totalorder %v943_v22, %v868_v16  ;;  %vm70_vm0 = vcmp.eq.s32.totalorder %v958_v23, %v859_v12  ;;  %vm191_vm1 = vcmp.eq.s32.totalorder %v958_v23, %v861_v13  ;;  %v303_v34 = vand.u32 127, %v1026_v28 }
  0x1c   :  { %605 = vmatpush.msk.msra.mxu0 %vm73_vm4, %v816_v18  ;;  %637 = vmatpush.msk.msra.mxu2 %vm194_vm5, %v816_v18  ;;  %vm130_vm2 = vcmp.eq.s32.totalorder %v958_v23, %v863_v14  ;;  %vm252_vm3 = vcmp.eq.s32.totalorder %v958_v23, %v868_v16  ;;  %vm69_vm4 = vcmp.eq.s32.totalorder %v973_v24, %v859_v12  ;;  %v425_v35 = vand.u32 127, %v1028_v29 }
  0x1d   :  { %621 = vmatpush.msk.msra.mxu1 %vm133_vm6, %v816_v18  ;;  %653 = vmatpush.msk.msra.mxu3 %vm255_vm7, %v816_v18  ;;  %vm190_vm5 = vcmp.eq.s32.totalorder %v973_v24, %v861_v13  ;;  %vm129_vm6 = vcmp.eq.s32.totalorder %v973_v24, %v863_v14  ;;  %vm251_vm7 = vcmp.eq.s32.totalorder %v973_v24, %v868_v16  ;;  %v364_v36 = vand.u32 127, %v1039_v31 }
  0x1e   :  { %606 = vmatpush.msk.msra.mxu0 %vm72_vm8, %v816_v18  ;;  %638 = vmatpush.msk.msra.mxu2 %vm193_vm9, %v816_v18  ;;  %vm68_vm8 = vcmp.eq.s32.totalorder %v988_v25, %v859_v12  ;;  %vm189_vm9 = vcmp.eq.s32.totalorder %v988_v25, %v861_v13  ;;  %v486_v37 = vand.u32 127, %v1041_v32  ;;  %v1104_v38 = vperm.slane %v303_v34, 0 }
  0x1f   :  { %622 = vmatpush.msk.msra.mxu1 %vm132_vm10, %v816_v18  ;;  %654 = vmatpush.msk.msra.mxu3 %vm254_vm11, %v816_v18  ;;  %vm128_vm10 = vcmp.eq.s32.totalorder %v988_v25, %v863_v14  ;;  %vm250_vm11 = vcmp.eq.s32.totalorder %v988_v25, %v868_v16  ;;  %v1106_v39 = vperm.slane %v425_v35, 0  ;;  %v1114_v40 = vperm.slane %v364_v36, 0 }
  0x20   :  { %607 = vmatpush.msk.msra.mxu0 %vm71_vm12, %v816_v18  ;;  %639 = vmatpush.msk.msra.mxu2 %vm192_vm13, %v816_v18  ;;  %vm67_vm12 = vcmp.eq.s32.totalorder %v1003_v26, %v859_v12  ;;  %vm188_vm13 = vcmp.eq.s32.totalorder %v1003_v26, %v861_v13  ;;  %v1116_v41 = vperm.slane %v486_v37, 0  ;;  %v121_v50 = vshra.s32 %v848_v5, 7 }
  0x21   :  { %623 = vmatpush.msk.msra.mxu1 %vm131_vm14, %v816_v18  ;;  %655 = vmatpush.msk.msra.mxu3 %vm253_vm15, %v816_v18  ;;  %vm127_vm14 = vcmp.eq.s32.totalorder %v1003_v26, %v863_v14  ;;  %vm249_vm15 = vcmp.eq.s32.totalorder %v1003_v26, %v868_v16  ;;  %v182_v51 = vshra.s32 %v846_v4, 7  ;;  %v61_v52 = vshra.s32 %v844_v3, 7 }
  0x22   :  { %608 = vmatpush.msk.msra.mxu0 %vm70_vm0, %v816_v18  ;;  %640 = vmatpush.msk.msra.mxu2 %vm191_vm1, %v816_v18  ;;  %vm66_vm0 = vcmp.eq.s32.totalorder %v1018_v27, %v859_v12  ;;  %vm187_vm1 = vcmp.eq.s32.totalorder %v1018_v27, %v861_v13  ;;  %v243_v55 = vshra.s32 %v853_v9, 7  ;;  %v304_v58 = vshra.s32 %v1026_v28, 7 }
  0x23   :  { %624 = vmatpush.msk.msra.mxu1 %vm130_vm2, %v816_v18  ;;  %656 = vmatpush.msk.msra.mxu3 %vm252_vm3, %v816_v18  ;;  %vm126_vm2 = vcmp.eq.s32.totalorder %v1018_v27, %v863_v14  ;;  %vm248_vm3 = vcmp.eq.s32.totalorder %v1018_v27, %v868_v16  ;;  %v365_v62 = vshra.s32 %v1039_v31, 7  ;;  %v426_v6 = vshra.s32 %v1028_v29, 7 }
  0x24   :  { %609 = vmatpush.msk.msra.mxu0 %vm69_vm4, %v816_v18  ;;  %641 = vmatpush.msk.msra.mxu2 %vm190_vm5, %v816_v18  ;;  %vm65_vm4 = vcmp.eq.s32.totalorder %v1037_v30, %v859_v12  ;;  %vm186_vm5 = vcmp.eq.s32.totalorder %v1037_v30, %v861_v13  ;;  %v487_v9 = vshra.s32 %v1041_v32, 7 }
  0x25   :  { %625 = vmatpush.msk.msra.mxu1 %vm129_vm6, %v816_v18  ;;  %657 = vmatpush.msk.msra.mxu3 %vm251_vm7, %v816_v18  ;;  %vm125_vm6 = vcmp.eq.s32.totalorder %v1037_v30, %v863_v14  ;;  %vm247_vm7 = vcmp.eq.s32.totalorder %v1037_v30, %v868_v16 }
  0x26   :  { %610 = vmatpush.msk.msra.mxu0 %vm68_vm8, %v816_v18  ;;  %642 = vmatpush.msk.msra.mxu2 %vm189_vm9, %v816_v18  ;;  %vm64_vm8 = vcmp.eq.s32.totalorder %v1056_v33, %v859_v12  ;;  %vm185_vm9 = vcmp.eq.s32.totalorder %v1056_v33, %v861_v13 }
  0x27   :  { %626 = vmatpush.msk.msra.mxu1 %vm128_vm10, %v816_v18  ;;  %658 = vmatpush.msk.msra.mxu3 %vm250_vm11, %v816_v18  ;;  %vm124_vm10 = vcmp.eq.s32.totalorder %v1056_v33, %v863_v14  ;;  %vm246_vm11 = vcmp.eq.s32.totalorder %v1056_v33, %v868_v16 }
  0x28   :  { %611 = vmatpush.msk.msra.mxu0 %vm67_vm12, %v816_v18  ;;  %643 = vmatpush.msk.msra.mxu2 %vm188_vm13, %v816_v18  ;;  %vm63_vm12 = vcmp.eq.s32.totalorder %v839_v1, %v859_v12  ;;  %vm184_vm13 = vcmp.eq.s32.totalorder %v839_v1, %v861_v13 }
  0x29   :  { %627 = vmatpush.msk.msra.mxu1 %vm127_vm14, %v816_v18  ;;  %659 = vmatpush.msk.msra.mxu3 %vm249_vm15, %v816_v18  ;;  %vm123_vm14 = vcmp.eq.s32.totalorder %v839_v1, %v863_v14  ;;  %vm245_vm15 = vcmp.eq.s32.totalorder %v839_v1, %v868_v16 }
  0x2a   :  { %612 = vmatpush.msk.msra.mxu0 %vm66_vm0, %v816_v18  ;;  %644 = vmatpush.msk.msra.mxu2 %vm187_vm1, %v816_v18  ;;  %vm321_vm0 = vcmp.eq.s32.totalorder %v842_v2, %v1104_v38  ;;  %vm443_vm1 = vcmp.eq.s32.totalorder %v842_v2, %v1106_v39 }
  0x2b   :  { %628 = vmatpush.msk.msra.mxu1 %vm126_vm2, %v816_v18  ;;  %660 = vmatpush.msk.msra.mxu3 %vm248_vm3, %v816_v18  ;;  %vm382_vm2 = vcmp.eq.s32.totalorder %v842_v2, %v1114_v40  ;;  %vm504_vm3 = vcmp.eq.s32.totalorder %v842_v2, %v1116_v41 }
  0x2c   :  { %613 = vmatpush.msk.msra.mxu0 %vm65_vm4, %v816_v18  ;;  %645 = vmatpush.msk.msra.mxu2 %vm186_vm5, %v816_v18  ;;  %vm320_vm4 = vcmp.eq.s32.totalorder %v856_v10, %v1104_v38  ;;  %vm442_vm5 = vcmp.eq.s32.totalorder %v856_v10, %v1106_v39 }
  0x2d   :  { %629 = vmatpush.msk.msra.mxu1 %vm125_vm6, %v816_v18  ;;  %661 = vmatpush.msk.msra.mxu3 %vm247_vm7, %v816_v18  ;;  %vm381_vm6 = vcmp.eq.s32.totalorder %v856_v10, %v1114_v40  ;;  %vm503_vm7 = vcmp.eq.s32.totalorder %v856_v10, %v1116_v41 }
  0x2e   :  { %614 = vmatpush.msk.msra.mxu0 %vm64_vm8, %v816_v18  ;;  %646 = vmatpush.msk.msra.mxu2 %vm185_vm9, %v816_v18  ;;  %vm319_vm8 = vcmp.eq.s32.totalorder %v866_v15, %v1104_v38  ;;  %vm441_vm9 = vcmp.eq.s32.totalorder %v866_v15, %v1106_v39 }
  0x2f   :  { %630 = vmatpush.msk.msra.mxu1 %vm124_vm10, %v816_v18  ;;  %662 = vmatpush.msk.msra.mxu3 %vm246_vm11, %v816_v18  ;;  %vm380_vm10 = vcmp.eq.s32.totalorder %v866_v15, %v1114_v40  ;;  %vm502_vm11 = vcmp.eq.s32.totalorder %v866_v15, %v1116_v41 }
  0x30   :  { %615 = vmatpush.msk.msra.mxu0 %vm63_vm12, %v816_v18  ;;  %647 = vmatpush.msk.msra.mxu2 %vm184_vm13, %v816_v18  ;;  %vm318_vm12 = vcmp.eq.s32.totalorder %v871_v17, %v1104_v38  ;;  %vm440_vm13 = vcmp.eq.s32.totalorder %v871_v17, %v1106_v39 }
  0x31   :  { %631 = vmatpush.msk.msra.mxu1 %vm123_vm14, %v816_v18  ;;  %663 = vmatpush.msk.msra.mxu3 %vm245_vm15, %v816_v18  ;;  %vm379_vm14 = vcmp.eq.s32.totalorder %v871_v17, %v1114_v40  ;;  %vm501_vm15 = vcmp.eq.s32.totalorder %v871_v17, %v1116_v41 }
  0x32   :  { %664 = vmatpush.msk.msrb.mxu0 %vm321_vm0, %v816_v18  ;;  %696 = vmatpush.msk.msrb.mxu2 %vm443_vm1, %v816_v18  ;;  %vm317_vm0 = vcmp.eq.s32.totalorder %v898_v19, %v1104_v38  ;;  %vm439_vm1 = vcmp.eq.s32.totalorder %v898_v19, %v1106_v39 }
  0x33   :  { %680 = vmatpush.msk.msrb.mxu1 %vm382_vm2, %v816_v18  ;;  %712 = vmatpush.msk.msrb.mxu3 %vm504_vm3, %v816_v18  ;;  %vm378_vm2 = vcmp.eq.s32.totalorder %v898_v19, %v1114_v40  ;;  %vm500_vm3 = vcmp.eq.s32.totalorder %v898_v19, %v1116_v41 }
  0x34   :  { %665 = vmatpush.msk.msrb.mxu0 %vm320_vm4, %v816_v18  ;;  %697 = vmatpush.msk.msrb.mxu2 %vm442_vm5, %v816_v18  ;;  %vm316_vm4 = vcmp.eq.s32.totalorder %v913_v20, %v1104_v38  ;;  %vm438_vm5 = vcmp.eq.s32.totalorder %v913_v20, %v1106_v39 }
  0x35   :  { %681 = vmatpush.msk.msrb.mxu1 %vm381_vm6, %v816_v18  ;;  %713 = vmatpush.msk.msrb.mxu3 %vm503_vm7, %v816_v18  ;;  %vm377_vm6 = vcmp.eq.s32.totalorder %v913_v20, %v1114_v40  ;;  %vm499_vm7 = vcmp.eq.s32.totalorder %v913_v20, %v1116_v41 }
  0x36   :  { %666 = vmatpush.msk.msrb.mxu0 %vm319_vm8, %v816_v18  ;;  %698 = vmatpush.msk.msrb.mxu2 %vm441_vm9, %v816_v18  ;;  %vm315_vm8 = vcmp.eq.s32.totalorder %v928_v21, %v1104_v38  ;;  %vm437_vm9 = vcmp.eq.s32.totalorder %v928_v21, %v1106_v39 }
  0x37   :  { %682 = vmatpush.msk.msrb.mxu1 %vm380_vm10, %v816_v18  ;;  %714 = vmatpush.msk.msrb.mxu3 %vm502_vm11, %v816_v18  ;;  %vm376_vm10 = vcmp.eq.s32.totalorder %v928_v21, %v1114_v40  ;;  %vm498_vm11 = vcmp.eq.s32.totalorder %v928_v21, %v1116_v41 }
  0x38   :  { %667 = vmatpush.msk.msrb.mxu0 %vm318_vm12, %v816_v18  ;;  %699 = vmatpush.msk.msrb.mxu2 %vm440_vm13, %v816_v18  ;;  %vm314_vm12 = vcmp.eq.s32.totalorder %v943_v22, %v1104_v38  ;;  %vm436_vm13 = vcmp.eq.s32.totalorder %v943_v22, %v1106_v39 }
  0x39   :  { %683 = vmatpush.msk.msrb.mxu1 %vm379_vm14, %v816_v18  ;;  %715 = vmatpush.msk.msrb.mxu3 %vm501_vm15, %v816_v18  ;;  %vm375_vm14 = vcmp.eq.s32.totalorder %v943_v22, %v1114_v40  ;;  %vm497_vm15 = vcmp.eq.s32.totalorder %v943_v22, %v1116_v41 }
  0x3a   :  { %668 = vmatpush.msk.msrb.mxu0 %vm317_vm0, %v816_v18  ;;  %700 = vmatpush.msk.msrb.mxu2 %vm439_vm1, %v816_v18  ;;  %vm313_vm0 = vcmp.eq.s32.totalorder %v958_v23, %v1104_v38  ;;  %vm435_vm1 = vcmp.eq.s32.totalorder %v958_v23, %v1106_v39 }
  0x3b   :  { %684 = vmatpush.msk.msrb.mxu1 %vm378_vm2, %v816_v18  ;;  %716 = vmatpush.msk.msrb.mxu3 %vm500_vm3, %v816_v18  ;;  %vm374_vm2 = vcmp.eq.s32.totalorder %v958_v23, %v1114_v40  ;;  %vm496_vm3 = vcmp.eq.s32.totalorder %v958_v23, %v1116_v41 }
  0x3c   :  { %669 = vmatpush.msk.msrb.mxu0 %vm316_vm4, %v816_v18  ;;  %701 = vmatpush.msk.msrb.mxu2 %vm438_vm5, %v816_v18  ;;  %vm312_vm4 = vcmp.eq.s32.totalorder %v973_v24, %v1104_v38  ;;  %vm434_vm5 = vcmp.eq.s32.totalorder %v973_v24, %v1106_v39 }
  0x3d   :  { %685 = vmatpush.msk.msrb.mxu1 %vm377_vm6, %v816_v18  ;;  %717 = vmatpush.msk.msrb.mxu3 %vm499_vm7, %v816_v18  ;;  %vm373_vm6 = vcmp.eq.s32.totalorder %v973_v24, %v1114_v40  ;;  %vm495_vm7 = vcmp.eq.s32.totalorder %v973_v24, %v1116_v41 }
  0x3e   :  { %670 = vmatpush.msk.msrb.mxu0 %vm315_vm8, %v816_v18  ;;  %702 = vmatpush.msk.msrb.mxu2 %vm437_vm9, %v816_v18  ;;  %vm311_vm8 = vcmp.eq.s32.totalorder %v988_v25, %v1104_v38  ;;  %vm433_vm9 = vcmp.eq.s32.totalorder %v988_v25, %v1106_v39 }
  0x3f   :  { %686 = vmatpush.msk.msrb.mxu1 %vm376_vm10, %v816_v18  ;;  %718 = vmatpush.msk.msrb.mxu3 %vm498_vm11, %v816_v18  ;;  %vm372_vm10 = vcmp.eq.s32.totalorder %v988_v25, %v1114_v40  ;;  %vm494_vm11 = vcmp.eq.s32.totalorder %v988_v25, %v1116_v41 }
  0x40   :  { %671 = vmatpush.msk.msrb.mxu0 %vm314_vm12, %v816_v18  ;;  %703 = vmatpush.msk.msrb.mxu2 %vm436_vm13, %v816_v18  ;;  %vm310_vm12 = vcmp.eq.s32.totalorder %v1003_v26, %v1104_v38  ;;  %vm432_vm13 = vcmp.eq.s32.totalorder %v1003_v26, %v1106_v39 }
  0x41   :  { %687 = vmatpush.msk.msrb.mxu1 %vm375_vm14, %v816_v18  ;;  %719 = vmatpush.msk.msrb.mxu3 %vm497_vm15, %v816_v18  ;;  %vm371_vm14 = vcmp.eq.s32.totalorder %v1003_v26, %v1114_v40  ;;  %vm493_vm15 = vcmp.eq.s32.totalorder %v1003_v26, %v1116_v41 }
  0x42   :  { %672 = vmatpush.msk.msrb.mxu0 %vm313_vm0, %v816_v18  ;;  %704 = vmatpush.msk.msrb.mxu2 %vm435_vm1, %v816_v18  ;;  %vm309_vm0 = vcmp.eq.s32.totalorder %v1018_v27, %v1104_v38  ;;  %vm431_vm1 = vcmp.eq.s32.totalorder %v1018_v27, %v1106_v39 }
  0x43   :  { %688 = vmatpush.msk.msrb.mxu1 %vm374_vm2, %v816_v18  ;;  %720 = vmatpush.msk.msrb.mxu3 %vm496_vm3, %v816_v18  ;;  %vm370_vm2 = vcmp.eq.s32.totalorder %v1018_v27, %v1114_v40  ;;  %vm492_vm3 = vcmp.eq.s32.totalorder %v1018_v27, %v1116_v41 }
  0x44   :  { %673 = vmatpush.msk.msrb.mxu0 %vm312_vm4, %v816_v18  ;;  %705 = vmatpush.msk.msrb.mxu2 %vm434_vm5, %v816_v18  ;;  %vm308_vm4 = vcmp.eq.s32.totalorder %v1037_v30, %v1104_v38  ;;  %vm430_vm5 = vcmp.eq.s32.totalorder %v1037_v30, %v1106_v39 }
  0x45   :  { %689 = vmatpush.msk.msrb.mxu1 %vm373_vm6, %v816_v18  ;;  %721 = vmatpush.msk.msrb.mxu3 %vm495_vm7, %v816_v18  ;;  %vm369_vm6 = vcmp.eq.s32.totalorder %v1037_v30, %v1114_v40  ;;  %vm491_vm7 = vcmp.eq.s32.totalorder %v1037_v30, %v1116_v41 }
  0x46   :  { %234 = vmatmul.f32.vlgmr.msra.gmra.mxu2 %v217_v42  ;;  %674 = vmatpush.msk.msrb.mxu0 %vm311_vm8, %v816_v18  ;;  %vm307_vm8 = vcmp.eq.s32.totalorder %v1056_v33, %v1104_v38 }
  0x47   :  { %706 = vmatpush.msk.msrb.mxu2 %vm433_vm9, %v816_v18  ;;  %295 = vmatmul.f32.vlgmr.msra.gmra.mxu3 %v278_v43  ;;  %vm429_vm9 = vcmp.eq.s32.totalorder %v1056_v33, %v1106_v39 }
  0x48   :  { %690 = vmatpush.msk.msrb.mxu1 %vm372_vm10, %v816_v18  ;;  %722 = vmatpush.msk.msrb.mxu3 %vm494_vm11, %v816_v18  ;;  %vm368_vm10 = vcmp.eq.s32.totalorder %v1056_v33, %v1114_v40  ;;  %vm490_vm11 = vcmp.eq.s32.totalorder %v1056_v33, %v1116_v41 }
  0x49   :  { %675 = vmatpush.msk.msrb.mxu0 %vm310_vm12, %v816_v18  ;;  %707 = vmatpush.msk.msrb.mxu2 %vm432_vm13, %v816_v18  ;;  %vm306_vm12 = vcmp.eq.s32.totalorder %v839_v1, %v1104_v38  ;;  %vm428_vm13 = vcmp.eq.s32.totalorder %v839_v1, %v1106_v39 }
  0x4a   :  { %112 = vmatmul.f32.vlgmr.msra.gmra.mxu0 %v95_v44  ;;  %691 = vmatpush.msk.msrb.mxu1 %vm371_vm14, %v816_v18  ;;  %vm367_vm14 = vcmp.eq.s32.totalorder %v839_v1, %v1114_v40 }
  0x4b   :  { %723 = vmatpush.msk.msrb.mxu3 %vm493_vm15, %v816_v18  ;;  %173 = vmatmul.f32.vlgmr.msra.gmra.mxu1 %v156_v45  ;;  %vm489_vm15 = vcmp.eq.s32.totalorder %v839_v1, %v1116_v41 }
  0x4c   :  { %676 = vmatpush.msk.msrb.mxu0 %vm309_vm0, %v816_v18  ;;  %708 = vmatpush.msk.msrb.mxu2 %vm431_vm1, %v816_v18  ;;  %vm177_vm0 = vcmp.eq.s32.totalorder %v839_v1, %v121_v50  ;;  %vm238_vm1 = vcmp.eq.s32.totalorder %v839_v1, %v182_v51 }
  0x4d   :  { %692 = vmatpush.msk.msrb.mxu1 %vm370_vm2, %v816_v18  ;;  %724 = vmatpush.msk.msrb.mxu3 %vm492_vm3, %v816_v18  ;;  %vm116_vm2 = vcmp.eq.s32.totalorder %v839_v1, %v61_v52  ;;  %vm299_vm3 = vcmp.eq.s32.totalorder %v839_v1, %v243_v55 }
  0x4e   :  { %677 = vmatpush.msk.msrb.mxu0 %vm308_vm4, %v816_v18  ;;  %709 = vmatpush.msk.msrb.mxu2 %vm430_vm5, %v816_v18  ;;  %vm567_vm4 = vcmask 1040384   ;;  %vm360_vm5 = vcmp.eq.s32.totalorder %v839_v1, %v304_v58 }
  0x4f   :  { %693 = vmatpush.msk.msrb.mxu1 %vm369_vm6, %v816_v18  ;;  %725 = vmatpush.msk.msrb.mxu3 %vm491_vm7, %v816_v18  ;;  %vm569_vm6 = vcmask 1041408   ;;  %vm421_vm7 = vcmp.eq.s32.totalorder %v839_v1, %v365_v62 }
  0x50   :  { %678 = vmatpush.msk.msrb.mxu0 %vm307_vm8, %v816_v18  ;;  %710 = vmatpush.msk.msrb.mxu2 %vm429_vm9, %v816_v18  ;;  %vm571_vm8 = vcmask 1042432   ;;  %vm573_vm9 = vcmask 1043456  }
  0x51   :  { %694 = vmatpush.msk.msrb.mxu1 %vm368_vm10, %v816_v18  ;;  %726 = vmatpush.msk.msrb.mxu3 %vm490_vm11, %v816_v18  ;;  %vm482_vm10 = vcmp.eq.s32.totalorder %v839_v1, %v426_v6  ;;  %vm543_vm11 = vcmp.eq.s32.totalorder %v839_v1, %v487_v9 }
  0x52   :  { %679 = vmatpush.msk.msrb.mxu0 %vm306_vm12, %v816_v18  ;;  %711 = vmatpush.msk.msrb.mxu2 %vm428_vm13, %v816_v18  ;;  %vm575_vm12 = vcmask 1044480   ;;  %vm577_vm13 = vcmask 1045504  }
  0x53   :  { %356 = vmatmul.f32.vlgmr.msrb.gmra.mxu0 %v339_v46  ;;  %695 = vmatpush.msk.msrb.mxu1 %vm367_vm14, %v816_v18  ;;  %vm579_vm14 = vcmask 1046528  }
  0x54   :  { %478 = vmatmul.f32.vlgmr.msrb.gmra.mxu2 %v461_v47  ;;  %727 = vmatpush.msk.msrb.mxu3 %vm489_vm15, %v816_v18 }
  0x55   :  { %417 = vmatmul.f32.vlgmr.msrb.gmra.mxu1 %v400_v48  ;;  %539 = vmatmul.f32.vlgmr.msrb.gmra.mxu3 %v522_v49 }
  0xc7   :  { %v113_v53 = vpop.f32.mrf.mxu0 }
  0xc8   :  { %v174_v54 = vpop.f32.mrf.mxu1  ;;  %v117_v63 = vsel %vm116_vm2, %v113_v53, 0.0 }
  0xc9   :  { %v178_v56 = vsel %vm177_vm0, %v174_v54, 0.0  ;;  %v235_v57 = vpop.f32.mrf.mxu2 }
  0xca   :  { %v547_v59 = vrot.slane %v178_v56, 7  ;;  %v239_v60 = vsel %vm238_vm1, %v235_v57, 0.0  ;;  %v296_v61 = vpop.f32.mrf.mxu3 }
  0xcb   :  { %v550_v0 = vrot.slane %v239_v60, 6  ;;  %v300_v2 = vsel %vm299_vm3, %v296_v61, 0.0 }
  0xcc   :  { %v568_v3 = vsel %vm567_vm4, %v117_v63, %v547_v59  ;;  %v553_v7 = vrot.slane %v300_v2, 5 }
  0xcd   :  { %v570_v10 = vsel %vm569_vm6, %v568_v3, %v550_v0 }
  0xce   :  { %v572_v13 = vsel %vm571_vm8, %v570_v10, %v553_v7 }
  0xd0   :  { %v357_v4 = vpop.f32.mrf.mxu0 }
  0xd1   :  { %v361_v5 = vsel %vm360_vm5, %v357_v4, 0.0 }
  0xd2   :  { %v418_v8 = vpop.f32.mrf.mxu1  ;;  %v556_v11 = vrot.slane %v361_v5, 4 }
  0xd3   :  { %v422_v12 = vsel %vm421_vm7, %v418_v8, 0.0 }
  0xd4   :  { %v559_v14 = vrot.slane %v422_v12, 3  ;;  %v574_v15 = vsel %vm573_vm9, %v572_v13, %v556_v11 }
  0xd6   :  { %v576_v21 = vsel %vm575_vm12, %v574_v15, %v559_v14 }
  0xd7   :  { %v479_v16 = vpop.f32.mrf.mxu2 }
  0xd8   :  { %v483_v17 = vsel %vm482_vm10, %v479_v16, 0.0  ;;  %v540_v18 = vpop.f32.mrf.mxu3 }
  0xd9   :  { %v562_v19 = vrot.slane %v483_v17, 2  ;;  %v544_v20 = vsel %vm543_vm11, %v540_v18, 0.0 }
  0xda   :  { %v565_v22 = vrot.slane %v544_v20, 1 }
  0xdb   :  { %v578_v23 = vsel %vm577_vm13, %v576_v21, %v562_v19 }
  0xdc   :  { %v580_v1 = vsel %vm579_vm14, %v578_v23, %v565_v22 }
  0xdd   :  { %581 = vst [vmem:[#allocation7] sm:$0xff] %v580_v1 }
  0xde   :  { %592 = dma.vmem_to_hbm [thread:$0]  %s588_s1, 128, %s590_s23, [#allocation4]  }
  0xdf   :  { %810 = dma.done.wait [#allocation4], 128  }
  0xe0   :  { %811 = vsyncadd [#allocation4], 4294967168 }
  0xe1   :  { %597 = vsyncpa [#allocation3], 1 }
  0xe2   :  { %598 = vsyncpa [#allocation6], 1 }
  0xe3   :  { %599 = vsyncpa [#allocation4], 1 }

</bundles_post_ra>
